<compile_context>
chip_gen: v5e
topology: v5e:2x2
jax: 0.10.0
libtpu: 0.0.40
codegen_flags: <defaults>
</compile_context>

<pallas_src>
import functools

import jax
import jax.numpy as jnp
from jax.experimental import pallas as pl
from jax.experimental.pallas import tpu as pltpu

_FOLD = 8     # sublanes per f32 vreg
_LANE = 128   # lanes per vreg


def _round_up(x, m):
    return ((x + m - 1) // m) * m


# ---------------------------------------------------------------------------
# Kernel 1: farthest point sampling (serial over the M samples)
# ---------------------------------------------------------------------------
def _fps_kernel(M, xyz_ref, idx_ref, dist_ref, pidx_ref):
    # xyz_ref : (1, 3, 8, L) f32   folded coords: point j -> (j // L, j % L)
    # idx_ref : (1, M_pad, 1) i32  output: original index of the i-th sample
    # dist_ref: (8, L) f32         running min squared distance (VMEM scratch)
    # pidx_ref: (8, L) i32         original point index of every folded slot
    L = dist_ref.shape[1]
    n_pad = _FOLD * L  # sentinel larger than any valid point index

    dist_ref[...] = jnp.full(dist_ref.shape, 1e10, dtype=jnp.float32)
    sub = jax.lax.broadcasted_iota(jnp.int32, pidx_ref.shape, 0)
    lan = jax.lax.broadcasted_iota(jnp.int32, pidx_ref.shape, 1)
    pidx_ref[...] = sub * L + lan
    # Rows >= M keep index 0; their gathered columns are sliced off later.
    idx_ref[...] = jnp.zeros(idx_ref.shape, dtype=jnp.int32)

    def body(i, farthest):
        # record the i-th selected original point index (scalar-sized store)
        idx_ref[0, pl.ds(i, 1), :] = jnp.broadcast_to(farthest, (1, 1))

        pidx = pidx_ref[...]
        sel = pidx == farthest                        # exactly one True slot

        # centroid extraction via the (reused) equality mask; the masked sum
        # is bit-exact because exactly one term is non-zero.
        x = xyz_ref[0, 0, :, :]
        cx = jnp.sum(jnp.where(sel, x, 0.0))
        dsq = (x - cx) ** 2
        y = xyz_ref[0, 1, :, :]
        cy = jnp.sum(jnp.where(sel, y, 0.0))
        dsq = dsq + (y - cy) ** 2
        z = xyz_ref[0, 2, :, :]
        cz = jnp.sum(jnp.where(sel, z, 0.0))
        dsq = dsq + (z - cz) ** 2

        new_dist = jnp.minimum(dist_ref[...], dsq)
        dist_ref[...] = new_dist

        # argmax with first-occurrence (min original index) tie-break
        maxval = jnp.max(new_dist)
        nxt = jnp.min(jnp.where(new_dist == maxval, pidx, jnp.int32(n_pad)))
        return nxt

    jax.lax.fori_loop(0, M, body, jnp.int32(0))


# ---------------------------------------------------------------------------
# Kernel 2: gather the selected columns via an on-the-fly one-hot MXU matmul
# ---------------------------------------------------------------------------
def _gather_kernel(tni, idx_ref, stk_ref, out_ref, acc_ref):
    # idx_ref: (1, TM, 1) i32 ; stk_ref: (1, R_pad, TN) ; out_ref: (1, R_pad, TM)
    # acc_ref: (R_pad, TM) f32 accumulator (persists across the N grid axis)
    n = pl.program_id(2)
    tn = stk_ref.shape[2]

    @pl.when(n == 0)
    def _():
        acc_ref[...] = jnp.zeros_like(acc_ref)

    idx_col = idx_ref[0, :, :]                                  # (TM, 1) i32
    lanes = jax.lax.broadcasted_iota(jnp.int32, (1, tni), 1)    # (1, TNI)

    part = jnp.zeros(acc_ref.shape, dtype=jnp.float32)
    for t in range(0, tn, tni):          # short static loop (<= 2 bodies)
        blk = stk_ref[0, :, t:t + tni]                          # (R_pad, TNI)
        rel = idx_col - (n * tn + t)                            # (TM, 1)
        oh = (lanes == rel).astype(blk.dtype)                   # (TM, TNI)
        # contract the last dims of both operands (trans_b, no transpose)
        part = part + jax.lax.dot_general(
            blk, oh, (((1,), (1,)), ((), ())),
            preferred_element_type=jnp.float32)
    acc_ref[...] += part

    @pl.when(n == pl.num_programs(2) - 1)
    def _():
        out_ref[0, :, :] = acc_ref[...].astype(out_ref.dtype)


# ---------------------------------------------------------------------------
# Wrapper
# ---------------------------------------------------------------------------
@functools.partial(jax.jit, static_argnames=("ratio",))
def downsampling(xyz, feature, ratio):
    B, three, N = xyz.shape
    _, C, _ = feature.shape
    assert three == 3
    M = N // ratio
    assert M >= 1
    R = 3 + C

    N_pad = _round_up(N, _FOLD * _LANE)   # multiple of 1024 -> lane-dense fold
    M_pad = _round_up(M, _LANE)
    R_pad = _round_up(R, _FOLD)
    L = N_pad // _FOLD

    # ---------------- FPS phase (xyz only, f32, sublane-folded) -----------
    xyz_f32 = xyz.astype(jnp.float32)     # canonical: FPS distances in f32
    if N_pad > N:
        # edge-pad: duplicates of point N-1 never win the min-index tie-break
        xyz_f32 = jnp.pad(xyz_f32, ((0, 0), (0, 0), (0, N_pad - N)), mode="edge")
    xyz_fold = xyz_f32.reshape(B, 3, _FOLD, L)

    idx = pl.pallas_call(
        functools.partial(_fps_kernel, M),
        out_shape=jax.ShapeDtypeStruct((B, M_pad, 1), jnp.int32),
        grid_spec=pltpu.PrefetchScalarGridSpec(
            num_scalar_prefetch=0,
            grid=(B,),
            in_specs=[pl.BlockSpec((1, 3, _FOLD, L), lambda b: (b, 0, 0, 0))],
            out_specs=pl.BlockSpec((1, M_pad, 1), lambda b: (b, 0, 0)),
            scratch_shapes=[
                pltpu.VMEM((_FOLD, L), jnp.float32),  # running min distance
                pltpu.VMEM((_FOLD, L), jnp.int32),    # original point index
            ],
        ),
        compiler_params=pltpu.CompilerParams(dimension_semantics=("parallel",)),
    )(xyz_fold)

    # ---------------- gather phase (fused xyz+feature, MXU) ---------------
    stacked = jnp.concatenate([xyz, feature], axis=1)            # (B, R, N)
    if N_pad > N:
        stacked = jnp.pad(stacked, ((0, 0), (0, 0), (0, N_pad - N)))  # zeros
    if R_pad > R:
        stacked = jnp.pad(stacked, ((0, 0), (0, R_pad - R), (0, 0)))

    # TM=256 matches the 256-wide MXU of v6e/v7x; use 128 on v5e.
    TM = 256 if M_pad % 256 == 0 else 128
    TN = min(512, N_pad)      # N_pad is a multiple of 1024, so this divides
    TNI = min(256, TN)        # one-hot sub-chunk: keeps vreg pressure low

    out = pl.pallas_call(
        functools.partial(_gather_kernel, TNI),
        out_shape=jax.ShapeDtypeStruct((B, R_pad, M_pad), stacked.dtype),
        grid_spec=pltpu.PrefetchScalarGridSpec(
            num_scalar_prefetch=0,
            grid=(B, M_pad // TM, N_pad // TN),
            in_specs=[
                pl.BlockSpec((1, TM, 1), lambda b, m, n: (b, m, 0)),
                pl.BlockSpec((1, R_pad, TN), lambda b, m, n: (b, 0, n)),
            ],
            out_specs=pl.BlockSpec((1, R_pad, TM), lambda b, m, n: (b, 0, m)),
            scratch_shapes=[pltpu.VMEM((R_pad, TM), jnp.float32)],
        ),
        compiler_params=pltpu.CompilerParams(
            dimension_semantics=("parallel", "parallel", "arbitrary")),
    )(idx, stacked)

    sampled = out[:, 0:3, 0:M].astype(xyz.dtype)
    sampled_feature = out[:, 3:3 + C, 0:M].astype(feature.dtype)
    return sampled, sampled_feature


# ---------------------------------------------------------------------------
# Pure-JAX reference (PyTorch forward semantics, FPS start index 0)
# ---------------------------------------------------------------------------
def _reference(xyz, feature, ratio):
    B, _, N = xyz.shape
    M = N // ratio
    xyz_t = jnp.transpose(xyz, (0, 2, 1)).astype(jnp.float32)   # (B, N, 3)
    feat_t = jnp.transpose(feature, (0, 2, 1))                  # (B, N, C)
    sampled_xyz, sampled_feat = [], []
    for b in range(B):
        pts = xyz_t[b]
        dist = jnp.full((N,), 1e10, jnp.float32)
        far = 0
        idxs = []
        for _ in range(M):
            idxs.append(far)
            d = jnp.sum((pts - pts[far]) ** 2, axis=-1)
            dist = jnp.minimum(dist, d)
            far = int(jnp.argmax(dist))
        idxs = jnp.array(idxs)
        sampled_xyz.append(jnp.transpose(xyz, (0, 2, 1))[b][idxs])   # (M, 3)
        sampled_feat.append(feat_t[b][idxs])                         # (M, C)
    sampled_xyz = jnp.stack(sampled_xyz).transpose(0, 2, 1)          # (B, 3, M)
    sampled_feat = jnp.stack(sampled_feat).transpose(0, 2, 1)        # (B, C, M)
    return sampled_xyz.astype(xyz.dtype), sampled_feat.astype(feature.dtype)


if __name__ == "__main__":
    key = jax.random.PRNGKey(0)
    k1, k2, k3, k4 = jax.random.split(key, 4)

    # --- test 1: basic small shapes ---------------------------------------
    B, C, N, ratio = 2, 4, 16, 4
    xyz = jax.random.normal(k1, (B, 3, N), dtype=jnp.float32)
    feature = jax.random.normal(k2, (B, C, N), dtype=jnp.float32)

    sampled, sampled_feature = downsampling(xyz, feature, ratio=ratio)
    jax.block_until_ready((sampled, sampled_feature))

    ref_xyz, ref_feat = _reference(xyz, feature, ratio)
    assert sampled.shape == (B, 3, N // ratio)
    assert sampled_feature.shape == (B, C, N // ratio)
    assert jnp.allclose(sampled, ref_xyz, atol=1e-5)
    assert jnp.allclose(sampled_feature, ref_feat, atol=1e-5)

    # --- test 2: N not a multiple of the padding granularity + exact
    #             duplicate points (locks in the padding / tie-break claims) -
    B2, C2, N2, ratio2 = 1, 2, 20, 5
    xyz2 = jax.random.normal(k3, (B2, 3, N2), dtype=jnp.float32)
    xyz2 = xyz2.at[:, :, 12].set(xyz2[:, :, 7])     # duplicated point
    feat2 = jax.random.normal(k4, (B2, C2, N2), dtype=jnp.float32)

    s2, f2 = downsampling(xyz2, feat2, ratio=ratio2)
    jax.block_until_ready((s2, f2))
    r2x, r2f = _reference(xyz2, feat2, ratio2)
    assert jnp.allclose(s2, r2x, atol=1e-5)
    assert jnp.allclose(f2, r2f, atol=1e-5)

    print("KERNEL_OK")
</pallas_src>

<mosaic_0001>
module attributes {stable_mosaic.version = 11 : i64} {
  func.func @_fps_kernel(%arg0: i32, %arg1: memref<1x3x8x128xf32, #tpu.memory_space<vmem>>, %arg2: memref<1x128x1xi32, #tpu.memory_space<vmem>>, %arg3: memref<8x128xf32, #tpu.memory_space<vmem>>, %arg4: memref<8x128xi32, #tpu.memory_space<vmem>>) attributes {dimension_semantics = [#tpu.dimension_semantics<parallel>], iteration_bounds = array<i64: 2>, scalar_prefetch = 0 : i64, scratch_operands = 2 : i64, tpu.core_type = #tpu.core_type<tc>, window_params = [{transform_indices = @transform_0, window_bounds = array<i64: 1, 3, 8, 128>}, {transform_indices = @transform_1, window_bounds = array<i64: 1, 128, 1>}]} {
    %cst = arith.constant 1.000000e+10 : f32
    %0 = vector.broadcast %cst : f32 to vector<8x128xf32>
    %c0 = arith.constant 0 : index
    %c0_0 = arith.constant 0 : index
    %1 = vector.load %arg3[%c0, %c0_0] : memref<8x128xf32, #tpu.memory_space<vmem>>, vector<8x128xf32>
    tpu.vector_store %arg3[%c0, %c0_0], %0 {strides = array<i32>} : memref<8x128xf32, #tpu.memory_space<vmem>>, vector<8x128xf32>,
    %2 = tpu.iota {dimensions = array<i32: 0>} : vector<8x128xi32>
    %3 = tpu.iota {dimensions = array<i32: 1>} : vector<8x128xi32>
    %c128_i32 = arith.constant 128 : i32
    %4 = vector.broadcast %c128_i32 : i32 to vector<8x128xi32>
    %5 = arith.muli %2, %4 : vector<8x128xi32>
    %6 = arith.addi %5, %3 : vector<8x128xi32>
    %c0_1 = arith.constant 0 : index
    %c0_2 = arith.constant 0 : index
    %7 = vector.load %arg4[%c0_1, %c0_2] : memref<8x128xi32, #tpu.memory_space<vmem>>, vector<8x128xi32>
    tpu.vector_store %arg4[%c0_1, %c0_2], %6 {strides = array<i32>} : memref<8x128xi32, #tpu.memory_space<vmem>>, vector<8x128xi32>,
    %c0_i32 = arith.constant 0 : i32
    %8 = vector.broadcast %c0_i32 : i32 to vector<1x128x1xi32>
    %c0_3 = arith.constant 0 : index
    %c0_4 = arith.constant 0 : index
    %c0_5 = arith.constant 0 : index
    %9 = vector.load %arg2[%c0_3, %c0_4, %c0_5] : memref<1x128x1xi32, #tpu.memory_space<vmem>>, vector<1x128x1xi32>
    tpu.vector_store %arg2[%c0_3, %c0_4, %c0_5], %8 {strides = array<i32>} : memref<1x128x1xi32, #tpu.memory_space<vmem>>, vector<1x128x1xi32>,
    %c0_i32_6 = arith.constant 0 : i32
    %c0_i32_7 = arith.constant 0 : i32
    %c4_i32 = arith.constant 4 : i32
    %10 = arith.addi %c0_i32_7, %c4_i32 : i32
    %c1_i32 = arith.constant 1 : i32
    %11 = scf.for %arg5 = %c0_i32_7 to %10 step %c1_i32 iter_args(%arg6 = %c0_i32_6) -> (i32)  : i32 {
      %12 = vector.broadcast %arg6 : i32 to vector<1x1xi32>
      %c0_9 = arith.constant 0 : index
      %13 = arith.index_cast %arg5 : i32 to index
      %c0_10 = arith.constant 0 : index
      %14 = vector.load %arg2[%c0_9, %13, %c0_10] : memref<1x128x1xi32, #tpu.memory_space<vmem>>, vector<1x1x1xi32>
      %15 = vector.shape_cast %14 : vector<1x1x1xi32> to vector<1x1xi32>
      %16 = vector.shape_cast %12 : vector<1x1xi32> to vector<1x1x1xi32>
      tpu.vector_store %arg2[%c0_9, %13, %c0_10], %16 {strides = array<i32>} : memref<1x128x1xi32, #tpu.memory_space<vmem>>, vector<1x1x1xi32>,
      %c0_11 = arith.constant 0 : index
      %c0_12 = arith.constant 0 : index
      %17 = vector.load %arg4[%c0_11, %c0_12] : memref<8x128xi32, #tpu.memory_space<vmem>>, vector<8x128xi32>
      %18 = vector.broadcast %arg6 : i32 to vector<8x128xi32>
      %19 = arith.cmpi eq, %17, %18 : vector<8x128xi32>
      %c0_13 = arith.constant 0 : index
      %c0_14 = arith.constant 0 : index
      %c0_15 = arith.constant 0 : index
      %c0_16 = arith.constant 0 : index
      %20 = vector.load %arg1[%c0_13, %c0_14, %c0_15, %c0_16] : memref<1x3x8x128xf32, #tpu.memory_space<vmem>>, vector<1x1x8x128xf32>
      %21 = vector.shape_cast %20 : vector<1x1x8x128xf32> to vector<8x128xf32>
      %cst_17 = arith.constant 0.000000e+00 : f32
      %22 = vector.broadcast %cst_17 : f32 to vector<8x128xf32>
      %23 = arith.select %19, %21, %22 : vector<8x128xi1>, vector<8x128xf32>
      %24 = vector.shape_cast %23 : vector<8x128xf32> to vector<1x8x128xf32>
      %cst_18 = arith.constant dense<0.000000e+00> : vector<1xf32>
      %25 = vector.multi_reduction <add>, %24, %cst_18 [1, 2] : vector<1x8x128xf32> to vector<1xf32>
      %26 = vector.shape_cast %25 : vector<1xf32> to vector<1x1x1xf32>
      %27 = vector.extract %26[0, 0, 0] : f32 from vector<1x1x1xf32>
      %28 = vector.broadcast %27 : f32 to vector<8x128xf32>
      %29 = arith.subf %21, %28 : vector<8x128xf32>
      %30 = arith.mulf %29, %29 : vector<8x128xf32>
      %c0_19 = arith.constant 0 : index
      %c1 = arith.constant 1 : index
      %c0_20 = arith.constant 0 : index
      %c0_21 = arith.constant 0 : index
      %31 = vector.load %arg1[%c0_19, %c1, %c0_20, %c0_21] : memref<1x3x8x128xf32, #tpu.memory_space<vmem>>, vector<1x1x8x128xf32>
      %32 = vector.shape_cast %31 : vector<1x1x8x128xf32> to vector<8x128xf32>
      %cst_22 = arith.constant 0.000000e+00 : f32
      %33 = vector.broadcast %cst_22 : f32 to vector<8x128xf32>
      %34 = arith.select %19, %32, %33 : vector<8x128xi1>, vector<8x128xf32>
      %35 = vector.shape_cast %34 : vector<8x128xf32> to vector<1x8x128xf32>
      %cst_23 = arith.constant dense<0.000000e+00> : vector<1xf32>
      %36 = vector.multi_reduction <add>, %35, %cst_23 [1, 2] : vector<1x8x128xf32> to vector<1xf32>
      %37 = vector.shape_cast %36 : vector<1xf32> to vector<1x1x1xf32>
      %38 = vector.extract %37[0, 0, 0] : f32 from vector<1x1x1xf32>
      %39 = vector.broadcast %38 : f32 to vector<8x128xf32>
      %40 = arith.subf %32, %39 : vector<8x128xf32>
      %41 = arith.mulf %40, %40 : vector<8x128xf32>
      %42 = arith.addf %30, %41 : vector<8x128xf32>
      %c0_24 = arith.constant 0 : index
      %c2 = arith.constant 2 : index
      %c0_25 = arith.constant 0 : index
      %c0_26 = arith.constant 0 : index
      %43 = vector.load %arg1[%c0_24, %c2, %c0_25, %c0_26] : memref<1x3x8x128xf32, #tpu.memory_space<vmem>>, vector<1x1x8x128xf32>
      %44 = vector.shape_cast %43 : vector<1x1x8x128xf32> to vector<8x128xf32>
      %cst_27 = arith.constant 0.000000e+00 : f32
      %45 = vector.broadcast %cst_27 : f32 to vector<8x128xf32>
      %46 = arith.select %19, %44, %45 : vector<8x128xi1>, vector<8x128xf32>
      %47 = vector.shape_cast %46 : vector<8x128xf32> to vector<1x8x128xf32>
      %cst_28 = arith.constant dense<0.000000e+00> : vector<1xf32>
      %48 = vector.multi_reduction <add>, %47, %cst_28 [1, 2] : vector<1x8x128xf32> to vector<1xf32>
      %49 = vector.shape_cast %48 : vector<1xf32> to vector<1x1x1xf32>
      %50 = vector.extract %49[0, 0, 0] : f32 from vector<1x1x1xf32>
      %51 = vector.broadcast %50 : f32 to vector<8x128xf32>
      %52 = arith.subf %44, %51 : vector<8x128xf32>
      %53 = arith.mulf %52, %52 : vector<8x128xf32>
      %54 = arith.addf %42, %53 : vector<8x128xf32>
      %c0_29 = arith.constant 0 : index
      %c0_30 = arith.constant 0 : index
      %55 = vector.load %arg3[%c0_29, %c0_30] : memref<8x128xf32, #tpu.memory_space<vmem>>, vector<8x128xf32>
      %56 = arith.minimumf %55, %54 : vector<8x128xf32>
      %c0_31 = arith.constant 0 : index
      %c0_32 = arith.constant 0 : index
      %57 = vector.load %arg3[%c0_31, %c0_32] : memref<8x128xf32, #tpu.memory_space<vmem>>, vector<8x128xf32>
      tpu.vector_store %arg3[%c0_31, %c0_32], %56 {strides = array<i32>} : memref<8x128xf32, #tpu.memory_space<vmem>>, vector<8x128xf32>,
      %58 = vector.shape_cast %56 : vector<8x128xf32> to vector<1x8x128xf32>
      %cst_33 = arith.constant dense<0xFF800000> : vector<1xf32>
      %59 = vector.multi_reduction <maximumf>, %58, %cst_33 [1, 2] : vector<1x8x128xf32> to vector<1xf32>
      %60 = vector.shape_cast %59 : vector<1xf32> to vector<1x1x1xf32>
      %61 = vector.extract %60[0, 0, 0] : f32 from vector<1x1x1xf32>
      %62 = vector.broadcast %61 : f32 to vector<8x128xf32>
      %63 = arith.cmpf oeq, %56, %62 : vector<8x128xf32>
      %c1024_i32 = arith.constant 1024 : i32
      %64 = vector.broadcast %c1024_i32 : i32 to vector<8x128xi32>
      %65 = arith.select %63, %17, %64 : vector<8x128xi1>, vector<8x128xi32>
      %66 = vector.shape_cast %65 : vector<8x128xi32> to vector<1x8x128xi32>
      %cst_34 = arith.constant dense<2147483647> : vector<1xi32>
      %67 = vector.multi_reduction <minsi>, %66, %cst_34 [1, 2] : vector<1x8x128xi32> to vector<1xi32>
      %68 = vector.shape_cast %67 : vector<1xi32> to vector<1x1x1xi32>
      %69 = vector.extract %68[0, 0, 0] : i32 from vector<1x1x1xi32>
      scf.yield %69 : i32
    }
    %c4_i32_8 = arith.constant 4 : i32
    return
  }
  func.func @transform_0(%arg0: i32) -> (i32, i32, i32, i32) {
    %c0_i32 = arith.constant 0 : i32
    %c0_i32_0 = arith.constant 0 : i32
    %c0_i32_1 = arith.constant 0 : i32
    %c0_i32_2 = arith.constant 0 : i32
    return %arg0, %c0_i32, %c0_i32_0, %c0_i32_1 : i32, i32, i32, i32
  }
  func.func @transform_1(%arg0: i32) -> (i32, i32, i32) {
    %c0_i32 = arith.constant 0 : i32
    %c0_i32_0 = arith.constant 0 : i32
    %c0_i32_1 = arith.constant 0 : i32
    return %arg0, %c0_i32, %c0_i32_0 : i32, i32, i32
  }
}

module attributes {stable_mosaic.version = 11 : i64} {
  func.func @_gather_kernel(%arg0: i32, %arg1: i32, %arg2: i32, %arg3: memref<1x128x1xi32, #tpu.memory_space<vmem>>, %arg4: memref<1x8x512xf32, #tpu.memory_space<vmem>>, %arg5: memref<1x8x128xf32, #tpu.memory_space<vmem>>, %arg6: memref<8x128xf32, #tpu.memory_space<vmem>>) attributes {dimension_semantics = [#tpu.dimension_semantics<parallel>, #tpu.dimension_semantics<parallel>, #tpu.dimension_semantics<arbitrary>], iteration_bounds = array<i64: 2, 1, 2>, scalar_prefetch = 0 : i64, scratch_operands = 1 : i64, tpu.core_type = #tpu.core_type<tc>, window_params = [{transform_indices = @transform_0, window_bounds = array<i64: 1, 128, 1>}, {transform_indices = @transform_1, window_bounds = array<i64: 1, 8, 512>}, {transform_indices = @transform_2, window_bounds = array<i64: 1, 8, 128>}]} {
    %c0_i32 = arith.constant 0 : i32
    %0 = arith.cmpi eq, %arg2, %c0_i32 : i32
    %1 = arith.extui %0 : i1 to i32
    %c0_i32_0 = arith.constant 0 : i32
    %2 = arith.cmpi ne, %1, %c0_i32_0 : i32
    scf.if %2 {
      %cst_17 = arith.constant 0.000000e+00 : f32
      %39 = vector.broadcast %cst_17 : f32 to vector<8x128xf32>
      %c0_18 = arith.constant 0 : index
      %c0_19 = arith.constant 0 : index
      %40 = vector.load %arg6[%c0_18, %c0_19] : memref<8x128xf32, #tpu.memory_space<vmem>>, vector<8x128xf32>
      tpu.vector_store %arg6[%c0_18, %c0_19], %39 {strides = array<i32>} : memref<8x128xf32, #tpu.memory_space<vmem>>, vector<8x128xf32>,
    } else {
    }
    %c0 = arith.constant 0 : index
    %c0_1 = arith.constant 0 : index
    %c0_2 = arith.constant 0 : index
    %3 = vector.load %arg3[%c0, %c0_1, %c0_2] : memref<1x128x1xi32, #tpu.memory_space<vmem>>, vector<1x128x1xi32>
    %4 = vector.shape_cast %3 : vector<1x128x1xi32> to vector<128x1xi32>
    %5 = tpu.iota {dimensions = array<i32: 1>} : vector<1x256xi32>
    %cst = arith.constant 0.000000e+00 : f32
    %6 = vector.broadcast %cst : f32 to vector<8x128xf32>
    %c0_3 = arith.constant 0 : index
    %c0_4 = arith.constant 0 : index
    %c0_5 = arith.constant 0 : index
    %7 = vector.load %arg4[%c0_3, %c0_4, %c0_5] : memref<1x8x512xf32, #tpu.memory_space<vmem>>, vector<1x8x256xf32>
    %8 = vector.shape_cast %7 : vector<1x8x256xf32> to vector<8x256xf32>
    %c512_i32 = arith.constant 512 : i32
    %9 = arith.muli %arg2, %c512_i32 : i32
    %c0_i32_6 = arith.constant 0 : i32
    %10 = arith.addi %9, %c0_i32_6 : i32
    %11 = vector.broadcast %10 : i32 to vector<128x1xi32>
    %12 = arith.subi %4, %11 : vector<128x1xi32>
    %13 = vector.broadcast %5 : vector<1x256xi32> to vector<128x256xi32>
    %14 = vector.broadcast %12 : vector<128x1xi32> to vector<128x256xi32>
    %15 = arith.cmpi eq, %13, %14 : vector<128x256xi32>
    %16 = arith.extui %15 : vector<128x256xi1> to vector<128x256xi32>
    %17 = arith.sitofp %16 : vector<128x256xi32> to vector<128x256xf32>
    %cst_7 = arith.constant dense<0.000000e+00> : vector<8x128xf32>
    %18 = tpu.matmul %8, %17, %cst_7 {dimension_numbers = #tpu.dot_dimension_numbers<[1], [1], [0], [0], [0, 0, 1, 0], [], []>} : vector<8x256xf32>, vector<128x256xf32>, vector<8x128xf32> -> vector<8x128xf32>
    %19 = arith.addf %6, %18 : vector<8x128xf32>
    %c0_8 = arith.constant 0 : index
    %c0_9 = arith.constant 0 : index
    %c256 = arith.constant 256 : index
    %20 = vector.load %arg4[%c0_8, %c0_9, %c256] : memref<1x8x512xf32, #tpu.memory_space<vmem>>, vector<1x8x256xf32>
    %21 = vector.shape_cast %20 : vector<1x8x256xf32> to vector<8x256xf32>
    %c512_i32_10 = arith.constant 512 : i32
    %22 = arith.muli %arg2, %c512_i32_10 : i32
    %c256_i32 = arith.constant 256 : i32
    %23 = arith.addi %22, %c256_i32 : i32
    %24 = vector.broadcast %23 : i32 to vector<128x1xi32>
    %25 = arith.subi %4, %24 : vector<128x1xi32>
    %26 = vector.broadcast %5 : vector<1x256xi32> to vector<128x256xi32>
    %27 = vector.broadcast %25 : vector<128x1xi32> to vector<128x256xi32>
    %28 = arith.cmpi eq, %26, %27 : vector<128x256xi32>
    %29 = arith.extui %28 : vector<128x256xi1> to vector<128x256xi32>
    %30 = arith.sitofp %29 : vector<128x256xi32> to vector<128x256xf32>
    %cst_11 = arith.constant dense<0.000000e+00> : vector<8x128xf32>
    %31 = tpu.matmul %21, %30, %cst_11 {dimension_numbers = #tpu.dot_dimension_numbers<[1], [1], [0], [0], [0, 0, 1, 0], [], []>} : vector<8x256xf32>, vector<128x256xf32>, vector<8x128xf32> -> vector<8x128xf32>
    %32 = arith.addf %19, %31 : vector<8x128xf32>
    %c0_12 = arith.constant 0 : index
    %c0_13 = arith.constant 0 : index
    %33 = vector.load %arg6[%c0_12, %c0_13] : memref<8x128xf32, #tpu.memory_space<vmem>>, vector<8x128xf32>
    %34 = arith.addf %33, %32 : vector<8x128xf32>
    %c0_14 = arith.constant 0 : index
    %c0_15 = arith.constant 0 : index
    %35 = vector.load %arg6[%c0_14, %c0_15] : memref<8x128xf32, #tpu.memory_space<vmem>>, vector<8x128xf32>
    tpu.vector_store %arg6[%c0_14, %c0_15], %34 {strides = array<i32>} : memref<8x128xf32, #tpu.memory_space<vmem>>, vector<8x128xf32>,
    %c1_i32 = arith.constant 1 : i32
    %36 = arith.cmpi eq, %arg2, %c1_i32 : i32
    %37 = arith.extui %36 : i1 to i32
    %c0_i32_16 = arith.constant 0 : i32
    %38 = arith.cmpi ne, %37, %c0_i32_16 : i32
    scf.if %38 {
      %c0_17 = arith.constant 0 : index
      %c0_18 = arith.constant 0 : index
      %39 = vector.load %arg6[%c0_17, %c0_18] : memref<8x128xf32, #tpu.memory_space<vmem>>, vector<8x128xf32>
      %c0_19 = arith.constant 0 : index
      %c0_20 = arith.constant 0 : index
      %c0_21 = arith.constant 0 : index
      %40 = vector.load %arg5[%c0_19, %c0_20, %c0_21] : memref<1x8x128xf32, #tpu.memory_space<vmem>>, vector<1x8x128xf32>
      %41 = vector.shape_cast %40 : vector<1x8x128xf32> to vector<8x128xf32>
      %42 = vector.shape_cast %39 : vector<8x128xf32> to vector<1x8x128xf32>
      tpu.vector_store %arg5[%c0_19, %c0_20, %c0_21], %42 {strides = array<i32>} : memref<1x8x128xf32, #tpu.memory_space<vmem>>, vector<1x8x128xf32>,
    } else {
    }
    return
  }
  func.func @transform_0(%arg0: i32, %arg1: i32, %arg2: i32) -> (i32, i32, i32) {
    %c0_i32 = arith.constant 0 : i32
    %c0_i32_0 = arith.constant 0 : i32
    return %arg0, %arg1, %c0_i32 : i32, i32, i32
  }
  func.func @transform_1(%arg0: i32, %arg1: i32, %arg2: i32) -> (i32, i32, i32) {
    %c0_i32 = arith.constant 0 : i32
    %c0_i32_0 = arith.constant 0 : i32
    return %arg0, %c0_i32, %arg2 : i32, i32, i32
  }
  func.func @transform_2(%arg0: i32, %arg1: i32, %arg2: i32) -> (i32, i32, i32) {
    %c0_i32 = arith.constant 0 : i32
    %c0_i32_0 = arith.constant 0 : i32
    return %arg0, %c0_i32, %arg1 : i32, i32, i32
  }
}

</mosaic_0001>

<bundles_post_ra>
// kernel: downsampling.2
= control target key start
LH: loop header
LB: loop body
LE: loop exit
PB: predicated region body
PF: predicated region fallthrough
CT: control target
= control target key end

     0   :  { %s390_s6 = smov 0   ;;  %s465_s0 = inlined_call_operand.vmem [shape: f32[2,3,8,128], index: 0, kind: input, shape index: {}]   ;;  %s466_s1 = inlined_call_operand.vmem [shape: s32[2,128,1], index: 1, kind: output, shape index: {}]  }
   0x1 LB: > { %s304_s7 = sadd.s32 4294967295, %s368_s6   ;;  %p308_p0 = scmp.ge.s32.totalorder %s368_s6, 1  ;;  %s368_s6 = sphi %s390_s6, %s11_s6  }
   0x2   : > { %p87_p1 = scmp.lt.s32.totalorder %s368_s6, 3 }
   0x4   : > { %p88_p2 = pnand %p308_p0, %p87_p1 }
   0x5   : > { %p107_p3 = scmp.lt.s32.totalorder (!%p88_p2), %s304_s7, 1  ;;  %s440_s16 = smov (!%p88_p2), 0  }
   0x6   : > { %91 = sbr.rel (%p88_p2) target bundleno = 716 (0x2cc), region = 24  ;;  %s442_s17 = smov (!%p88_p2), 0  }
   0xb   : > { %v118_v0 = vlaneseq  ;;  %v378_v1 = vmov 1e+10   ;;  %s468_s7 = smov (!%p107_p3, %s304_s7), 1  ;;  %vm125_vm0 = vcmask 7168   ;;  %v379_v6 = vmov 0  }
   0xc   : > { %117 = vst [vmem:[#allocation2] sm:$0xff] %v378_v1  ;;  %s317_s8 = smul.u32 24, %s468_s7  ;;  %s316_s9 = sshll.u32 %s468_s7, 7 }
   0xd   : > { %v119_v2 = vshrl.u32 %v118_v0, 7  ;;  %v121_v3 = vand.u32 127, %v118_v0  ;;  %s401_s12 = scalar_lea.vmem %s466_s1, %s316_s9 }
   0xe   : > { %s406_s15 = scalar_lea.vmem %s465_s0, %s317_s8  ;;  %126 = vst.msk [vmem:[%s401_s12] sm:$0xff] %vm125_vm0, %v379_v6 }
   0xf   : > { %v122_v4 = vmul.u32 128, %v119_v2  ;;  %127 = vst.msk [vmem:[%s401_s12 + $0x8] sm:$0xff] %vm125_vm0, %v379_v6 }
  0x10   : > { %128 = vst.msk [vmem:[%s401_s12 + $0x10] sm:$0xff] %vm125_vm0, %v379_v6 }
  0x11   : > { %v123_v5 = vadd.s32 %v122_v4, %v121_v3  ;;  %129 = vst.msk [vmem:[%s401_s12 + $0x18] sm:$0xff] %vm125_vm0, %v379_v6 }
  0x12   : > { %130 = vst.msk [vmem:[%s401_s12 + $0x20] sm:$0xff] %vm125_vm0, %v379_v6 }
  0x13   : > { %124 = vst [vmem:[#allocation3] sm:$0xff] %v123_v5 }
  0x14   : > { %131 = vst.msk [vmem:[%s401_s12 + $0x28] sm:$0xff] %vm125_vm0, %v379_v6 }
  0x15   : > { %132 = vst.msk [vmem:[%s401_s12 + $0x30] sm:$0xff] %vm125_vm0, %v379_v6 }
  0x16   : > { %133 = vst.msk [vmem:[%s401_s12 + $0x38] sm:$0xff] %vm125_vm0, %v379_v6 }
  0x17   : > { %134 = vst.msk [vmem:[%s401_s12 + $0x40] sm:$0xff] %vm125_vm0, %v379_v6 }
  0x18   : > { %135 = vst.msk [vmem:[%s401_s12 + $0x48] sm:$0xff] %vm125_vm0, %v379_v6 }
  0x19   : > { %136 = vst.msk [vmem:[%s401_s12 + $0x50] sm:$0xff] %vm125_vm0, %v379_v6 }
  0x1a   : > { %137 = vst.msk [vmem:[%s401_s12 + $0x58] sm:$0xff] %vm125_vm0, %v379_v6 }
  0x1b   : > { %138 = vst.msk [vmem:[%s401_s12 + $0x60] sm:$0xff] %vm125_vm0, %v379_v6 }
  0x1c   : > { %139 = vst.msk [vmem:[%s401_s12 + $0x68] sm:$0xff] %vm125_vm0, %v379_v6 }
  0x1d   : > { %140 = vst.msk [vmem:[%s401_s12 + $0x70] sm:$0xff] %vm125_vm0, %v379_v6 }
  0x1e   : > { %141 = vst.msk [vmem:[%s401_s12 + $0x78] sm:$0xff] %vm125_vm0, %v379_v6 }
  0x1f LB: >> { %vm151_vm1 = vcmask 0   ;;  %v448_v7 = vld [vmem:[#allocation3] sm:$0xff]  ;;  %v155_v8 = vld [vmem:[%s406_s15] sm:$0xff]  ;;  %v313_v9 = vld [vmem:[%s406_s15 + $0x10] sm:$0xff]  ;;  %v149_v10 = vstv %s372_s16  ;;  %s150_s18 = scalar_lea.vmem %s401_s12, %s376_s17  ;;  %s147_s17 = sadd.s32 1, %s376_s17   ;;  %s376_s17 = sphi %s442_s17, %s147_s17   ;;  %s372_s16 = sphi %s440_s16, %s327_s16  }
  0x20   : >> { %vm154_vm2 = vcmp.eq.s32.totalorder %v448_v7, %v149_v10  ;;  %152 = vst.msk [vmem:[%s150_s18] sm:$0x1] %vm151_vm1, %v149_v10  ;;  %v312_v13 = vld [vmem:[%s406_s15 + $0x8] sm:$0xff]  ;;  %v201_v46 = vld [vmem:[#allocation2] sm:$0xff]  ;;  %p144_p4 = scmp.ge.s32.totalorder %s147_s17, 4  }
  0x21   : >> { %v156_v11 = vsel %vm154_vm2, %v155_v8, 0.0  ;;  %v187_v12 = vsel %vm154_vm2, %v313_v9, 0.0  ;;  %v171_v14 = vsel %vm154_vm2, %v312_v13, 0.0 }
  0x22   : >> { %157 = vadd.xlane.f32.xlu0 %v156_v11  ;;  %188 = vadd.xlane.f32.xlu1 %v187_v12 }
  0x2a   : >> { %172 = vadd.xlane.f32.xlu0 %v171_v14 }
  0x95   : >> { %v158_v15 = vpop.xlane.xlu0 %157  ;;  %v189_v16 = vpop.xlane.xlu1 %188 }
  0x96   : >> { %v159_v17 = vrot.slane %v158_v15, 4  ;;  %v190_v18 = vrot.slane %v189_v16, 4 }
  0x98   : >> { %v160_v19 = vadd.f32 %v159_v17, %v158_v15  ;;  %v191_v20 = vadd.f32 %v190_v18, %v189_v16 }
  0x9a   : >> { %v161_v21 = vrot.slane %v160_v19, 2  ;;  %v192_v23 = vrot.slane %v191_v20, 2 }
  0x9c   : >> { %v162_v22 = vadd.f32 %v161_v21, %v160_v19  ;;  %v193_v29 = vadd.f32 %v192_v23, %v191_v20 }
  0x9d   : >> { %v173_v24 = vpop.xlane.xlu0 %172 }
  0x9e   : >> { %v174_v25 = vrot.slane %v173_v24, 4  ;;  %v163_v26 = vrot.slane %v162_v22, 1  ;;  %v194_v32 = vrot.slane %v193_v29, 1 }
  0xa0   : >> { %v175_v27 = vadd.f32 %v174_v25, %v173_v24  ;;  %v164_v28 = vadd.f32 %v163_v26, %v162_v22  ;;  %v195_v35 = vadd.f32 %v194_v32, %v193_v29 }
  0xa2   : >> { %v176_v30 = vrot.slane %v175_v27, 2  ;;  %318 = vpush %v164_v28 }
  0xa4   : >> { %v177_v31 = vadd.f32 %v176_v30, %v175_v27 }
  0xa6   : >> { %v178_v33 = vrot.slane %v177_v31, 1 }
  0xa8   : >> { %v179_v34 = vadd.f32 %v178_v33, %v177_v31 }
  0xaa   : >> { %320 = vpush %v179_v34 }
  0xab   : >> { %322 = vpush %v195_v35 }
  0xd3   : >> { %s319_s19 = spop %318 }
  0xd4   : >> { %v166_v36 = vstv %s319_s19 }
  0xd5   : >> { %v167_v37 = vsub.f32 %v155_v8, %v166_v36 }
  0xd7   : >> { %v168_v42 = vmul.f32 %v167_v37, %v167_v37 }
  0xdb   : >> { %s321_s20 = spop %320 }
  0xdc   : >> { %v181_v38 = vstv %s321_s20  ;;  %s323_s21 = spop %322 }
  0xdd   : >> { %v182_v39 = vsub.f32 %v312_v13, %v181_v38  ;;  %v197_v40 = vstv %s323_s21 }
  0xde   : >> { %v198_v41 = vsub.f32 %v313_v9, %v197_v40 }
  0xdf   : >> { %v183_v43 = vmul.f32 %v182_v39, %v182_v39 }
  0xe0   : >> { %v199_v45 = vmul.f32 %v198_v41, %v198_v41 }
  0xe1   : >> { %v184_v44 = vadd.f32 %v183_v43, %v168_v42 }
  0xe3   : >> { %v200_v47 = vadd.f32 %v199_v45, %v184_v44 }
  0xe5   : >> { %v202_v48 = vmin.f32 %v201_v46, %v200_v47 }
  0xe7   : >> { %204 = vmax.xlane.f32.xlu1 %v202_v48  ;;  %203 = vst [vmem:[#allocation2] sm:$0xff] %v202_v48 }
 0x15a   : >> { %v205_v49 = vpop.xlane.xlu1 %204 }
 0x15b   : >> { %v206_v50 = vrot.slane %v205_v49, 4 }
 0x15d   : >> { %v207_v51 = vmax.f32 %v205_v49, %v206_v50 }
 0x15f   : >> { %v208_v52 = vrot.slane %v207_v51, 2 }
 0x161   : >> { %v209_v53 = vmax.f32 %v207_v51, %v208_v52 }
 0x163   : >> { %v210_v54 = vrot.slane %v209_v53, 1 }
 0x165   : >> { %v211_v55 = vmax.f32 %v209_v53, %v210_v54 }
 0x167   : >> { %324 = vpush %v211_v55 }
 0x198   : >> { %s325_s22 = spop %324 }
 0x199   : >> { %v213_v56 = vstv %s325_s22 }
 0x19a   : >> { %vm214_vm3 = vcmp.eq.f32.partialorder %v202_v48, %v213_v56 }
 0x19b   : >> { %v215_v57 = vsel %vm214_vm3, %v448_v7, 1024 }
 0x19c   : >> { %v217_v58 = vshra.s32 %v215_v57, 16  ;;  %v216_v60 = vand.u32 65535, %v215_v57 }
 0x19e   : >> { %v219_v59 = vcvt.s32.f32 %v217_v58  ;;  %v218_v62 = vcvt.s32.f32 %v216_v60 }
 0x1a0   : >> { %220 = vmin.xlane.f32.xlu2 %v219_v59 }
 0x213   : >> { %v221_v61 = vpop.xlane.xlu2 %220 }
 0x214   : >> { %vm222_vm4 = vcmp.eq.f32.partialorder %v219_v59, %v221_v61  ;;  %v227_v0 = vcvt.f32.s32 %v221_v61 }
 0x215   : >> { %v223_v63 = vsel %vm222_vm4, %v218_v62, inf }
 0x216   : >> { %224 = vmin.xlane.f32.xlu2 %v223_v63  ;;  %v228_v2 = vshll.u32 %v227_v0, 16 }
 0x289   : >> { %v225_v1 = vpop.xlane.xlu2 %224 }
 0x28a   : >> { %v226_v3 = vcvt.f32.s32 %v225_v1 }
 0x28c   : >> { %v229_v4 = vadd.s32 %v228_v2, %v226_v3 }
 0x28e   : >> { %v230_v5 = vrot.slane %v229_v4, 4 }
 0x290   : >> { %vm231_vm5 = vcmp.lt.s32.totalorder %v229_v4, %v230_v5 }
 0x291   : >> { %v232_v6 = vsel %vm231_vm5, %v229_v4, %v230_v5 }
 0x292   : >> { %v233_v8 = vrot.slane %v232_v6, 2 }
 0x294   : >> { %vm234_vm6 = vcmp.lt.s32.totalorder %v232_v6, %v233_v8 }
 0x295   : >> { %v235_v7 = vsel %vm234_vm6, %v232_v6, %v233_v8 }
 0x296   : >> { %v236_v9 = vrot.slane %v235_v7, 1 }
 0x298   : >> { %vm237_vm7 = vcmp.lt.s32.totalorder %v235_v7, %v236_v9 }
 0x299   : >> { %v238_v10 = vsel %vm237_vm7, %v235_v7, %v236_v9 }
 0x29a   : >> { %326 = vpush %v238_v10 }
 0x2c7   : > { %146 = sbr.rel (!%p144_p4) target bundleno = 31 (0x1f), region = 64 }
 0x2cb   : >> { %s327_s16 = spop %326  }
 0x2cc PF: > { %s11_s6 = sadd.s32 1, %s368_s6  }
 0x2cd   : > { %p8_p5 = scmp.ge.s32.totalorder %s11_s6, 4  }
 0x2cf   :  { %10 = sbr.rel (!%p8_p5) target bundleno = 1 (0x1), region = 75 }

// kernel: downsampling.3
= control target key start
LH: loop header
LB: loop body
LE: loop exit
PB: predicated region body
PF: predicated region fallthrough
CT: control target
= control target key end

     0   :  { %s1012_s9 = smov 0   ;;  %s1014_s10 = smov 0   ;;  %s1268_s0 = inlined_call_operand.vmem [shape: s32[2,128,1], index: 0, kind: input, shape index: {}]   ;;  %s1269_s1 = inlined_call_operand.vmem [shape: f32[2,8,1024], index: 1, kind: input, shape index: {}]   ;;  %s1270_s2 = inlined_call_operand.vmem [shape: f32[2,8,128], index: 2, kind: output, shape index: {}]  }
   0x1   :  { %s1016_s11 = smov 0   ;;  %s1018_s12 = smov 0  }
   0x2   :  { %s1020_s13 = smov 0  }
   0x3 LB: > { %s24_s14 = sadd.s32 1, %s984_s11  ;;  %s31_s15 = sadd.s32 1, %s988_s12  ;;  %s992_s13 = sphi %s1020_s13, %s12_s13   ;;  %s988_s12 = sphi %s1018_s12, %s1274_s12   ;;  %s984_s11 = sphi %s1016_s11, %s1273_s11   ;;  %s980_s10 = sphi %s1014_s10, %s1272_s10   ;;  %s976_s9 = sphi %s1012_s9, %s1271_s9  }
   0x4   : > { %p25_p0 = scmp.ge.s32.totalorder %s24_s14, 2  ;;  %p767_p1 = scmp.ge.s32.totalorder %s992_s13, 1 }
   0x5   : > { %p157_p2 = scmp.lt.s32.totalorder %s992_s13, 5 }
   0x6   : > { %s1276_s14 = smov (%p25_p0, %s24_s14), 0  ;;  %s1278_s15 = smov (!%p25_p0, %s31_s15), %s988_s12 }
   0x7   : > { %p158_p3 = pnand %p767_p1, %p157_p2  ;;  %p33_p4 = scmp.ge.s32.totalorder %s1278_s15, 2 }
   0x8   : > { %p195_p5 = scmp.lt.s32.totalorder (!%p158_p3), %s980_s10, 1  ;;  %s770_s16 = sshll.u32 (!%p158_p3), %s976_s9, 2 }
   0x9   : > { %s1280_s15 = smov (%p33_p4, %s1278_s15), 0  ;;  %161 = sbr.rel (%p158_p3) target bundleno = 375 (0x177), region = 28 }
   0xa   : > { %p207_p6 = scmp.lt.s32.totalorder (!%p158_p3), %s770_s16, 7  ;;  %p774_p7 = scmp.ne.s32.totalorder (!%p158_p3), %s976_s9, 0 }
   0xe   : > { %s1282_s10 = smov (!%p195_p5, %s980_s10), 1  ;;  %s1284_s16 = smov (!%p207_p6, %s770_s16), 7 }
   0xf   : > { %s907_s17 = sshll.u32 %s1282_s10, 7  ;;  %s771_s18 = sshll.u32 %s1282_s10, 3 }
  0x10   : > { %s1048_s21 = scalar_lea.vmem %s1268_s0, %s907_s17  ;;  %s210_s22 = sadd.s32 %s771_s18, %s1284_s16 }
  0x11   : > { %s772_s23 = sshll.u32 %s210_s22, 3  ;;  %s1053_s26 = scalar_lea.vmem %s1270_s2, %s771_s18 }
  0x12   : > { %s1058_s29 = scalar_lea.vmem %s1269_s1, %s772_s23  ;;  %224 = sbr.rel (%p774_p7) target bundleno = 25 (0x19), region = 32 }
  0x17   : > { %v994_v0 = vmov 0.0  }
  0x18   : > { %225 = vst [vmem:[#allocation2] sm:$0xff] %v994_v0 }
  0x19 PF: > { %v241_v1 = vld [vmem:[%s1048_s21 + $0x78] sm:$0xff]  ;;  %s775_s30 = sshll.u32 %s976_s9, 9  ;;  %v240_v2 = vld [vmem:[%s1048_s21 + $0x70] sm:$0xff]  ;;  %v995_v3 = vmov 0   ;;  %v239_v9 = vld [vmem:[%s1048_s21 + $0x68] sm:$0xff]  ;;  %v242_v53 = vlaneseq  ;;  %v996_v59 = vmov 1.0  }
  0x1a   : > { %951 = vset.pattern.permute.xlu0 %v995_v3  ;;  %953 = vset.pattern.permute.xlu2 %v995_v3  ;;  %v1064_v4 = vstv %s775_s30  ;;  %s411_s3 = sadd.s32 256, %s775_s30  ;;  %v238_v10 = vld [vmem:[%s1048_s21 + $0x60] sm:$0xff]  ;;  %v237_v14 = vld [vmem:[%s1048_s21 + $0x58] sm:$0xff]  ;;  %v236_v18 = vld [vmem:[%s1048_s21 + $0x50] sm:$0xff]  ;;  %p904_p8 = scmp.ne.s32.totalorder %s976_s9, 1 }
  0x1b   : > { %952 = vset.pattern.permute.xlu1 %v995_v3  ;;  %v264_v5 = vsub.s32 %v241_v1, %v1064_v4  ;;  %v1067_v6 = vstv %s411_s3  ;;  %v263_v11 = vsub.s32 %v240_v2, %v1064_v4  ;;  %v262_v12 = vsub.s32 %v239_v9, %v1064_v4  ;;  %v235_v19 = vld [vmem:[%s1048_s21 + $0x48] sm:$0xff]  ;;  %v234_v23 = vld [vmem:[%s1048_s21 + $0x40] sm:$0xff]  ;;  %v233_v27 = vld [vmem:[%s1048_s21 + $0x38] sm:$0xff] }
  0x1c   : > { %v428_v7 = vsub.s32 %v241_v1, %v1067_v6  ;;  %v427_v8 = vsub.s32 %v240_v2, %v1067_v6  ;;  %v261_v13 = vsub.s32 %v238_v10, %v1064_v4  ;;  %v426_v15 = vsub.s32 %v239_v9, %v1067_v6  ;;  %v232_v28 = vld [vmem:[%s1048_s21 + $0x30] sm:$0xff]  ;;  %v231_v32 = vld [vmem:[%s1048_s21 + $0x28] sm:$0xff]  ;;  %v230_v36 = vld [vmem:[%s1048_s21 + $0x20] sm:$0xff] }
  0x1d   : > { %311 = vperm.xlu0 %951, %v264_v5   ;;  %v425_v16 = vsub.s32 %v238_v10, %v1067_v6  ;;  %v260_v17 = vsub.s32 %v237_v14, %v1064_v4  ;;  %v259_v20 = vsub.s32 %v236_v18, %v1064_v4  ;;  %v424_v21 = vsub.s32 %v237_v14, %v1067_v6  ;;  %v229_v37 = vld [vmem:[%s1048_s21 + $0x18] sm:$0xff]  ;;  %v228_v41 = vld [vmem:[%s1048_s21 + $0x10] sm:$0xff]  ;;  %v227_v45 = vld [vmem:[%s1048_s21 + $0x8] sm:$0xff] }
  0x1e   : > { %475 = vperm.xlu1 %952, %v428_v7   ;;  %472 = vperm.xlu2 %953, %v427_v8   ;;  %v258_v22 = vsub.s32 %v235_v19, %v1064_v4  ;;  %v423_v24 = vsub.s32 %v236_v18, %v1067_v6  ;;  %v422_v25 = vsub.s32 %v235_v19, %v1067_v6  ;;  %v226_v46 = vld [vmem:[%s1048_s21] sm:$0xff]  ;;  %v1114_v54 = vand.u32 127, %v242_v53 }
  0x1f   : > { %v257_v26 = vsub.s32 %v234_v23, %v1064_v4  ;;  %v256_v29 = vsub.s32 %v233_v27, %v1064_v4  ;;  %v421_v30 = vsub.s32 %v234_v23, %v1067_v6  ;;  %v255_v31 = vsub.s32 %v232_v28, %v1064_v4  ;;  %v246_v23 = vld [vmem:[%s1058_s29 + $0x8] sm:$0xff] }
  0x20   : > { %v420_v33 = vsub.s32 %v233_v27, %v1067_v6  ;;  %v419_v34 = vsub.s32 %v232_v28, %v1067_v6  ;;  %v254_v35 = vsub.s32 %v231_v32, %v1064_v4  ;;  %v253_v38 = vsub.s32 %v230_v36, %v1064_v4  ;;  %v410_v27 = vld [vmem:[%s1058_s29 + $0x18] sm:$0xff] }
  0x21   : > { %v418_v39 = vsub.s32 %v231_v32, %v1067_v6  ;;  %v252_v40 = vsub.s32 %v229_v37, %v1064_v4  ;;  %v417_v42 = vsub.s32 %v230_v36, %v1067_v6  ;;  %v416_v43 = vsub.s32 %v229_v37, %v1067_v6 }
  0x22   : > { %v251_v44 = vsub.s32 %v228_v41, %v1064_v4  ;;  %v250_v47 = vsub.s32 %v227_v45, %v1064_v4  ;;  %v415_v48 = vsub.s32 %v228_v41, %v1067_v6  ;;  %v249_v49 = vsub.s32 %v226_v46, %v1064_v4 }
  0x23   : > { %v414_v50 = vsub.s32 %v227_v45, %v1067_v6  ;;  %v413_v51 = vsub.s32 %v226_v46, %v1067_v6  ;;  %v1117_v56 = vadd.s32 128, %v1114_v54 }
  0x25   : > { %308 = vperm.xlu0 %951, %v263_v11  }
  0x26   : > { %305 = vperm.xlu1 %952, %v262_v12   ;;  %302 = vperm.xlu2 %953, %v261_v13  }
  0x2d   : > { %469 = vperm.xlu0 %951, %v426_v15  }
  0x2e   : > { %466 = vperm.xlu2 %953, %v425_v16   ;;  %299 = vperm.xlu1 %952, %v260_v17  }
  0x35   : > { %296 = vperm.xlu0 %951, %v259_v20  }
  0x36   : > { %463 = vperm.xlu1 %952, %v424_v21   ;;  %293 = vperm.xlu2 %953, %v258_v22   ;;  %v245_v22 = vld [vmem:[%s1058_s29] sm:$0xff] }
  0x3d   : > { %460 = vperm.xlu0 %951, %v423_v24  }
  0x3e   : > { %457 = vperm.xlu2 %953, %v422_v25   ;;  %290 = vperm.xlu1 %952, %v257_v26   ;;  %v409_v26 = vld [vmem:[%s1058_s29 + $0x10] sm:$0xff] }
  0x45   : > { %287 = vperm.xlu0 %951, %v256_v29  }
  0x46   : > { %454 = vperm.xlu1 %952, %v421_v30   ;;  %284 = vperm.xlu2 %953, %v255_v31  }
  0x4d   : > { %451 = vperm.xlu0 %951, %v420_v33  }
  0x4e   : > { %448 = vperm.xlu2 %953, %v419_v34   ;;  %281 = vperm.xlu1 %952, %v254_v35   ;;  %v653_v34 = vld [vmem:[#allocation2] sm:$0xff] }
  0x55   : > { %278 = vperm.xlu0 %951, %v253_v38  }
  0x56   : > { %445 = vperm.xlu1 %952, %v418_v39   ;;  %275 = vperm.xlu2 %953, %v252_v40  }
  0x5d   : > { %442 = vperm.xlu0 %951, %v417_v42  }
  0x5e   : > { %439 = vperm.xlu2 %953, %v416_v43   ;;  %272 = vperm.xlu1 %952, %v251_v44  }
  0x65   : > { %269 = vperm.xlu0 %951, %v250_v47  }
  0x66   : > { %436 = vperm.xlu1 %952, %v415_v48   ;;  %266 = vperm.xlu2 %953, %v249_v49  }
  0x6d   : > { %433 = vperm.xlu0 %951, %v414_v50  }
  0x6e   : > { %430 = vperm.xlu1 %952, %v413_v51  }
  0x78   : > { %v473_v52 = vpop.permute.xlu2 %472 }
  0x79   : > { %vm505_vm4 = vcmp.eq.s32.totalorder %v1114_v54, %v473_v52  ;;  %vm506_vm5 = vcmp.eq.s32.totalorder %v1117_v56, %v473_v52 }
  0x80   : > { %v303_v55 = vpop.permute.xlu2 %302 }
  0x81   : > { %vm337_vm12 = vcmp.eq.s32.totalorder %v1114_v54, %v303_v55  ;;  %vm338_vm13 = vcmp.eq.s32.totalorder %v1117_v56, %v303_v55 }
  0x88   : > { %v467_v60 = vpop.permute.xlu2 %466 }
  0x89   : > { %vm501_vm14 = vcmp.eq.s32.totalorder %v1114_v54, %v467_v60  ;;  %vm502_vm15 = vcmp.eq.s32.totalorder %v1117_v56, %v467_v60 }
  0x8f   : > { %v312_v57 = vpop.permute.xlu0 %311 }
  0x90   : > { %v476_v58 = vpop.permute.xlu1 %475  ;;  %vm343_vm0 = vcmp.eq.s32.totalorder %v1114_v54, %v312_v57  ;;  %vm344_vm1 = vcmp.eq.s32.totalorder %v1117_v56, %v312_v57  ;;  %v294_v63 = vpop.permute.xlu2 %293 }
  0x91   : > { %872 = vmatpush.xpose.msk.msra.mxu2 %vm343_vm0, %v996_v59  ;;  %888 = vmatpush.xpose.msk.msra.mxu3 %vm344_vm1, %v996_v59  ;;  %vm507_vm2 = vcmp.eq.s32.totalorder %v1114_v54, %v476_v58  ;;  %vm508_vm3 = vcmp.eq.s32.totalorder %v1117_v56, %v476_v58 }
  0x92   : > { %840 = vmatpush.xpose.msk.msra.mxu0 %vm507_vm2, %v996_v59  ;;  %856 = vmatpush.xpose.msk.msra.mxu1 %vm508_vm3, %v996_v59 }
  0x96   : > { %841 = vmatpush.xpose.msk.msra.mxu0 %vm505_vm4, %v996_v59  ;;  %857 = vmatpush.xpose.msk.msra.mxu1 %vm506_vm5, %v996_v59 }
  0x97   : > { %v309_v61 = vpop.permute.xlu0 %308 }
  0x98   : > { %v306_v62 = vpop.permute.xlu1 %305  ;;  %vm341_vm6 = vcmp.eq.s32.totalorder %v1114_v54, %v309_v61  ;;  %vm342_vm7 = vcmp.eq.s32.totalorder %v1117_v56, %v309_v61  ;;  %v458_v2 = vpop.permute.xlu2 %457 }
  0x99   : > { %873 = vmatpush.xpose.msk.msra.mxu2 %vm341_vm6, %v996_v59  ;;  %889 = vmatpush.xpose.msk.msra.mxu3 %vm342_vm7, %v996_v59  ;;  %vm339_vm8 = vcmp.eq.s32.totalorder %v1114_v54, %v306_v62  ;;  %vm340_vm9 = vcmp.eq.s32.totalorder %v1117_v56, %v306_v62  ;;  %vm331_vm6 = vcmp.eq.s32.totalorder %v1114_v54, %v294_v63 }
  0x9a   : > { %vm332_vm7 = vcmp.eq.s32.totalorder %v1117_v56, %v294_v63 }
  0x9d   : > { %874 = vmatpush.xpose.msk.msra.mxu2 %vm339_vm8, %v996_v59  ;;  %890 = vmatpush.xpose.msk.msra.mxu3 %vm340_vm9, %v996_v59 }
  0x9f   : > { %v470_v0 = vpop.permute.xlu0 %469 }
  0xa0   : > { %v300_v1 = vpop.permute.xlu1 %299  ;;  %vm503_vm10 = vcmp.eq.s32.totalorder %v1114_v54, %v470_v0  ;;  %vm504_vm11 = vcmp.eq.s32.totalorder %v1117_v56, %v470_v0  ;;  %v285_v7 = vpop.permute.xlu2 %284 }
  0xa1   : > { %842 = vmatpush.xpose.msk.msra.mxu0 %vm503_vm10, %v996_v59  ;;  %858 = vmatpush.xpose.msk.msra.mxu1 %vm504_vm11, %v996_v59  ;;  %vm335_vm0 = vcmp.eq.s32.totalorder %v1114_v54, %v300_v1  ;;  %vm336_vm1 = vcmp.eq.s32.totalorder %v1117_v56, %v300_v1 }
  0xa2   : > { %875 = vmatpush.xpose.msk.msra.mxu2 %vm337_vm12, %v996_v59  ;;  %891 = vmatpush.xpose.msk.msra.mxu3 %vm338_vm13, %v996_v59  ;;  %vm495_vm12 = vcmp.eq.s32.totalorder %v1114_v54, %v458_v2  ;;  %vm496_vm13 = vcmp.eq.s32.totalorder %v1117_v56, %v458_v2 }
  0xa5   : > { %843 = vmatpush.xpose.msk.msra.mxu0 %vm501_vm14, %v996_v59  ;;  %859 = vmatpush.xpose.msk.msra.mxu1 %vm502_vm15, %v996_v59 }
  0xa6   : > { %876 = vmatpush.xpose.msk.msra.mxu2 %vm335_vm0, %v996_v59  ;;  %892 = vmatpush.xpose.msk.msra.mxu3 %vm336_vm1, %v996_v59 }
  0xa7   : > { %v297_v3 = vpop.permute.xlu0 %296 }
  0xa8   : > { %v464_v4 = vpop.permute.xlu1 %463  ;;  %vm333_vm2 = vcmp.eq.s32.totalorder %v1114_v54, %v297_v3  ;;  %vm334_vm3 = vcmp.eq.s32.totalorder %v1117_v56, %v297_v3  ;;  %v449_v10 = vpop.permute.xlu2 %448 }
  0xa9   : > { %vm499_vm4 = vcmp.eq.s32.totalorder %v1114_v54, %v464_v4  ;;  %vm500_vm5 = vcmp.eq.s32.totalorder %v1117_v56, %v464_v4 }
  0xaa   : > { %877 = vmatpush.xpose.msk.msra.mxu2 %vm333_vm2, %v996_v59  ;;  %893 = vmatpush.xpose.msk.msra.mxu3 %vm334_vm3, %v996_v59  ;;  %vm325_vm2 = vcmp.eq.s32.totalorder %v1114_v54, %v285_v7  ;;  %vm326_vm3 = vcmp.eq.s32.totalorder %v1117_v56, %v285_v7 }
  0xab   : > { %844 = vmatpush.xpose.msk.msra.mxu0 %vm499_vm4, %v996_v59  ;;  %860 = vmatpush.xpose.msk.msra.mxu1 %vm500_vm5, %v996_v59 }
  0xae   : > { %878 = vmatpush.xpose.msk.msra.mxu2 %vm331_vm6, %v996_v59  ;;  %894 = vmatpush.xpose.msk.msra.mxu3 %vm332_vm7, %v996_v59 }
  0xaf   : > { %v461_v5 = vpop.permute.xlu0 %460 }
  0xb0   : > { %v291_v6 = vpop.permute.xlu1 %290  ;;  %vm497_vm8 = vcmp.eq.s32.totalorder %v1114_v54, %v461_v5  ;;  %vm498_vm9 = vcmp.eq.s32.totalorder %v1117_v56, %v461_v5  ;;  %v276_v13 = vpop.permute.xlu2 %275 }
  0xb1   : > { %845 = vmatpush.xpose.msk.msra.mxu0 %vm497_vm8, %v996_v59  ;;  %861 = vmatpush.xpose.msk.msra.mxu1 %vm498_vm9, %v996_v59  ;;  %vm329_vm10 = vcmp.eq.s32.totalorder %v1114_v54, %v291_v6  ;;  %vm330_vm11 = vcmp.eq.s32.totalorder %v1117_v56, %v291_v6  ;;  %vm489_vm8 = vcmp.eq.s32.totalorder %v1114_v54, %v449_v10 }
  0xb2   : > { %879 = vmatpush.xpose.msk.msra.mxu2 %vm329_vm10, %v996_v59  ;;  %895 = vmatpush.xpose.msk.msra.mxu3 %vm330_vm11, %v996_v59  ;;  %vm490_vm9 = vcmp.eq.s32.totalorder %v1117_v56, %v449_v10 }
  0xb5   : > { %846 = vmatpush.xpose.msk.msra.mxu0 %vm495_vm12, %v996_v59  ;;  %862 = vmatpush.xpose.msk.msra.mxu1 %vm496_vm13, %v996_v59 }
  0xb7   : > { %v288_v8 = vpop.permute.xlu0 %287 }
  0xb8   : > { %v455_v9 = vpop.permute.xlu1 %454  ;;  %vm327_vm14 = vcmp.eq.s32.totalorder %v1114_v54, %v288_v8  ;;  %vm328_vm15 = vcmp.eq.s32.totalorder %v1117_v56, %v288_v8  ;;  %v440_v16 = vpop.permute.xlu2 %439 }
  0xb9   : > { %880 = vmatpush.xpose.msk.msra.mxu2 %vm327_vm14, %v996_v59  ;;  %896 = vmatpush.xpose.msk.msra.mxu3 %vm328_vm15, %v996_v59  ;;  %vm493_vm0 = vcmp.eq.s32.totalorder %v1114_v54, %v455_v9  ;;  %vm494_vm1 = vcmp.eq.s32.totalorder %v1117_v56, %v455_v9  ;;  %vm319_vm14 = vcmp.eq.s32.totalorder %v1114_v54, %v276_v13 }
  0xba   : > { %847 = vmatpush.xpose.msk.msra.mxu0 %vm493_vm0, %v996_v59  ;;  %863 = vmatpush.xpose.msk.msra.mxu1 %vm494_vm1, %v996_v59  ;;  %vm320_vm15 = vcmp.eq.s32.totalorder %v1117_v56, %v276_v13 }
  0xbd   : > { %881 = vmatpush.xpose.msk.msra.mxu2 %vm325_vm2, %v996_v59  ;;  %897 = vmatpush.xpose.msk.msra.mxu3 %vm326_vm3, %v996_v59 }
  0xbf   : > { %v452_v11 = vpop.permute.xlu0 %451 }
  0xc0   : > { %v282_v12 = vpop.permute.xlu1 %281  ;;  %vm491_vm4 = vcmp.eq.s32.totalorder %v1114_v54, %v452_v11  ;;  %vm492_vm5 = vcmp.eq.s32.totalorder %v1117_v56, %v452_v11  ;;  %v267_v21 = vpop.permute.xlu2 %266 }
  0xc1   : > { %848 = vmatpush.xpose.msk.msra.mxu0 %vm491_vm4, %v996_v59  ;;  %864 = vmatpush.xpose.msk.msra.mxu1 %vm492_vm5, %v996_v59  ;;  %vm323_vm6 = vcmp.eq.s32.totalorder %v1114_v54, %v282_v12  ;;  %vm324_vm7 = vcmp.eq.s32.totalorder %v1117_v56, %v282_v12  ;;  %vm483_vm4 = vcmp.eq.s32.totalorder %v1114_v54, %v440_v16 }
  0xc2   : > { %882 = vmatpush.xpose.msk.msra.mxu2 %vm323_vm6, %v996_v59  ;;  %898 = vmatpush.xpose.msk.msra.mxu3 %vm324_vm7, %v996_v59  ;;  %vm484_vm5 = vcmp.eq.s32.totalorder %v1117_v56, %v440_v16 }
  0xc5   : > { %849 = vmatpush.xpose.msk.msra.mxu0 %vm489_vm8, %v996_v59  ;;  %865 = vmatpush.xpose.msk.msra.mxu1 %vm490_vm9, %v996_v59 }
  0xc7   : > { %v279_v14 = vpop.permute.xlu0 %278 }
  0xc8   : > { %v446_v15 = vpop.permute.xlu1 %445  ;;  %vm321_vm10 = vcmp.eq.s32.totalorder %v1114_v54, %v279_v14  ;;  %vm322_vm11 = vcmp.eq.s32.totalorder %v1117_v56, %v279_v14 }
  0xc9   : > { %883 = vmatpush.xpose.msk.msra.mxu2 %vm321_vm10, %v996_v59  ;;  %899 = vmatpush.xpose.msk.msra.mxu3 %vm322_vm11, %v996_v59  ;;  %vm487_vm12 = vcmp.eq.s32.totalorder %v1114_v54, %v446_v15  ;;  %vm488_vm13 = vcmp.eq.s32.totalorder %v1117_v56, %v446_v15  ;;  %vm313_vm10 = vcmp.eq.s32.totalorder %v1114_v54, %v267_v21 }
  0xca   : > { %850 = vmatpush.xpose.msk.msra.mxu0 %vm487_vm12, %v996_v59  ;;  %866 = vmatpush.xpose.msk.msra.mxu1 %vm488_vm13, %v996_v59  ;;  %vm314_vm11 = vcmp.eq.s32.totalorder %v1117_v56, %v267_v21 }
  0xcd   : > { %884 = vmatpush.xpose.msk.msra.mxu2 %vm319_vm14, %v996_v59  ;;  %900 = vmatpush.xpose.msk.msra.mxu3 %vm320_vm15, %v996_v59 }
  0xcf   : > { %v443_v17 = vpop.permute.xlu0 %442 }
  0xd0   : > { %v273_v18 = vpop.permute.xlu1 %272  ;;  %vm485_vm0 = vcmp.eq.s32.totalorder %v1114_v54, %v443_v17  ;;  %vm486_vm1 = vcmp.eq.s32.totalorder %v1117_v56, %v443_v17 }
  0xd1   : > { %851 = vmatpush.xpose.msk.msra.mxu0 %vm485_vm0, %v996_v59  ;;  %867 = vmatpush.xpose.msk.msra.mxu1 %vm486_vm1, %v996_v59  ;;  %vm317_vm2 = vcmp.eq.s32.totalorder %v1114_v54, %v273_v18  ;;  %vm318_vm3 = vcmp.eq.s32.totalorder %v1117_v56, %v273_v18 }
  0xd2   : > { %885 = vmatpush.xpose.msk.msra.mxu2 %vm317_vm2, %v996_v59  ;;  %901 = vmatpush.xpose.msk.msra.mxu3 %vm318_vm3, %v996_v59 }
  0xd5   : > { %852 = vmatpush.xpose.msk.msra.mxu0 %vm483_vm4, %v996_v59  ;;  %868 = vmatpush.xpose.msk.msra.mxu1 %vm484_vm5, %v996_v59 }
  0xd7   : > { %v270_v19 = vpop.permute.xlu0 %269 }
  0xd8   : > { %v437_v20 = vpop.permute.xlu1 %436  ;;  %vm315_vm6 = vcmp.eq.s32.totalorder %v1114_v54, %v270_v19  ;;  %vm316_vm7 = vcmp.eq.s32.totalorder %v1117_v56, %v270_v19 }
  0xd9   : > { %886 = vmatpush.xpose.msk.msra.mxu2 %vm315_vm6, %v996_v59  ;;  %902 = vmatpush.xpose.msk.msra.mxu3 %vm316_vm7, %v996_v59  ;;  %vm481_vm8 = vcmp.eq.s32.totalorder %v1114_v54, %v437_v20  ;;  %vm482_vm9 = vcmp.eq.s32.totalorder %v1117_v56, %v437_v20 }
  0xda   : > { %853 = vmatpush.xpose.msk.msra.mxu0 %vm481_vm8, %v996_v59  ;;  %869 = vmatpush.xpose.msk.msra.mxu1 %vm482_vm9, %v996_v59 }
  0xdd   : > { %887 = vmatpush.xpose.msk.msra.mxu2 %vm313_vm10, %v996_v59  ;;  %903 = vmatpush.xpose.msk.msra.mxu3 %vm314_vm11, %v996_v59 }
  0xdf   : > { %v434_v24 = vpop.permute.xlu0 %433 }
  0xe0   : > { %vm479_vm12 = vcmp.eq.s32.totalorder %v1114_v54, %v434_v24  ;;  %vm480_vm13 = vcmp.eq.s32.totalorder %v1117_v56, %v434_v24  ;;  %629 = vmatmul.f32.vlgmr.msra.gmra.mxu2 %v245_v22  ;;  %649 = vmatmul.f32.vlgmr.msra.gmra.mxu3 %v246_v23  ;;  %v431_v25 = vpop.permute.xlu1 %430 }
  0xe1   : > { %854 = vmatpush.xpose.msk.msra.mxu0 %vm479_vm12, %v996_v59  ;;  %870 = vmatpush.xpose.msk.msra.mxu1 %vm480_vm13, %v996_v59  ;;  %vm477_vm14 = vcmp.eq.s32.totalorder %v1114_v54, %v431_v25  ;;  %vm478_vm15 = vcmp.eq.s32.totalorder %v1117_v56, %v431_v25 }
  0xe5   : > { %855 = vmatpush.xpose.msk.msra.mxu0 %vm477_vm14, %v996_v59  ;;  %871 = vmatpush.xpose.msk.msra.mxu1 %vm478_vm15, %v996_v59 }
  0xe8   : > { %589 = vmatmul.f32.vlgmr.msra.gmra.mxu0 %v409_v26  ;;  %609 = vmatmul.f32.vlgmr.msra.gmra.mxu1 %v410_v27 }
 0x163   : > { %v630_v28 = vpop.f32.mrf.mxu2  ;;  %v650_v32 = vpop.f32.mrf.mxu3 }
 0x165   : > { %v590_v29 = vpop.f32.mrf.mxu0  ;;  %v610_v30 = vpop.f32.mrf.mxu1 }
 0x166   : > { %v611_v31 = vadd.f32 %v610_v30, %v590_v29 }
 0x168   : > { %v631_v33 = vadd.f32 %v630_v28, %v611_v31 }
 0x16a   : > { %v651_v35 = vadd.f32 %v650_v32, %v631_v33  ;;  %659 = sbr.rel (%p904_p8) target bundleno = 375 (0x177), region = 36 }
 0x16c   : > { %v654_v36 = vadd.f32 %v653_v34, %v651_v35 }
 0x16e   : > { %655 = vst [vmem:[#allocation2] sm:$0xff] %v654_v36 }
 0x175   : > { %v660_v37 = vld [vmem:[#allocation2] sm:$0xff] }
 0x176   : > { %661 = vst [vmem:[%s1053_s26] sm:$0xff] %v660_v37 }
 0x177 PF: > { %s12_s13 = sadd.s32 1, %s992_s13   ;;  %s1271_s9 = smov %s984_s11 }
 0x178   : > { %p9_p9 = scmp.ge.s32.totalorder %s12_s13, 6   ;;  %s1272_s10 = smov %s988_s12 }
 0x179   : > { %s1273_s11 = smov %s1276_s14  ;;  %s1274_s12 = smov %s1280_s15 }
 0x17a   :  { %11 = sbr.rel (!%p9_p9) target bundleno = 3 (0x3), region = 69 }

</bundles_post_ra>
